<compile_context>
chip_gen: v7x
topology: tpu7x:2x2x1
jax: 0.10.0
libtpu: 0.0.40
codegen_flags: <defaults>
</compile_context>

<pallas_src>
import jax
import jax.numpy as jnp
from jax.experimental import pallas as pl
from jax.experimental.pallas import tpu as pltpu


def _round_up(x, m):
    return ((x + m - 1) // m) * m


def make_kernel(filter_sizes, n_filters, n_mlp_layers, seq_len, seq_pad,
                col_offsets, compute_dtype):
    filter_sizes = tuple(filter_sizes)
    nf = n_filters
    n_conv = len(filter_sizes)

    def kernel(emb_ref, nums_ref, *refs):
        refs = list(refs)
        idx = 0
        convw_ref = refs[idx]; idx += 1
        conv_b_refs = refs[idx:idx + n_conv]; idx += n_conv
        mlp_refs = []
        for _ in range(n_mlp_layers):
            mlp_refs.append((refs[idx], refs[idx + 1])); idx += 2
        fc_conv_w_refs = refs[idx:idx + n_conv]; idx += n_conv
        fc_mlp_w_ref = refs[idx]; idx += 1
        fc_b_ref = refs[idx]; idx += 1
        out_ref = refs[idx]

        rows, E = emb_ref.shape                       # rows = BM * seq_pad
        BM = rows // seq_pad
        total_cols = convw_ref.shape[-1]
        out_pad = out_ref.shape[-1]

        # --- conv branch: ONE matmul for all filter sizes / kernel rows ---
        emb2d = emb_ref[...]                          # [BM*S_pad, E] compute_dtype
        proj = jnp.dot(emb2d, convw_ref[...],
                       preferred_element_type=jnp.float32)
        proj = proj.reshape(BM, seq_pad, total_cols)  # [BM, S_pad, sum(fs)*nf] f32

        out_acc = jnp.zeros((BM, out_pad), dtype=jnp.float32)

        for i, fs in enumerate(filter_sizes):
            c0 = col_offsets[i]
            L = seq_len - fs + 1
            # Shifted-window sum on the small projection result (not on emb).
            acc = proj[:, 0:L, c0:c0 + nf]
            for j in range(1, fs):
                acc = acc + proj[:, j:j + L, c0 + j * nf:c0 + (j + 1) * nf]
            acc = jnp.maximum(acc + conv_b_refs[i][...], 0.0)   # bias + ReLU (f32)
            pooled = jnp.max(acc, axis=1)                        # max-pool over time [BM, nf]
            # concat-free final fc: per-branch row block of fc_w
            out_acc = out_acc + jnp.dot(pooled.astype(compute_dtype),
                                        fc_conv_w_refs[i][...],
                                        preferred_element_type=jnp.float32)

        # --- MLP branch on nums ---
        h = nums_ref[...]                             # [BM, F] f32
        for w_ref, b_ref in mlp_refs:
            h = jnp.maximum(
                jnp.dot(h.astype(compute_dtype), w_ref[...],
                        preferred_element_type=jnp.float32) + b_ref[...],
                0.0)
        out_acc = out_acc + jnp.dot(h.astype(compute_dtype), fc_mlp_w_ref[...],
                                    preferred_element_type=jnp.float32)

        # --- (identity dropout) + fc bias; lane-dense store [BM, out_pad] ---
        out_ref[...] = out_acc + fc_b_ref[...]

    return kernel


def cnn_plus_mlp_forward(text, nums, params, filter_sizes, n_filters, output_dim,
                         compute_dtype=jnp.bfloat16, block_batch=128):
    """text: [S, B] int32, nums: [F, B] float32 (PyTorch convention; permuted inside).

    block_batch: batch-block size per grid step (keep BM*S*E double-buffers
    within the scoped VMEM limit, esp. on v7x's 64 MiB per TensorCore).
    """
    filter_sizes = tuple(filter_sizes)
    nf = n_filters
    n_conv = len(filter_sizes)

    t = text.T                                        # [B, S]
    n = nums.T.astype(jnp.float32)                    # [B, F]
    B, S = t.shape
    F_in = n.shape[1]

    # TODO(synk): at production sizes, move this gather into the kernel via
    # PrefetchScalarGridSpec-prefetched token ids instead of materializing
    # the [B, S, E] embedded tensor in HBM.
    emb = params["emb"][t].astype(compute_dtype)      # [B, S, E]
    E = emb.shape[2]

    # Batch / sequence blocking (BM multiple of 8; S padded to multiple of 8
    # so the in-kernel reshape of the projection is layout-clean).
    BM = min(block_batch, _round_up(B, 8))
    B_pad = _round_up(B, BM)
    S_pad = _round_up(S, 8)
    emb = jnp.pad(emb, ((0, B_pad - B), (0, S_pad - S), (0, 0)))
    n = jnp.pad(n, ((0, B_pad - B), (0, 0)))
    emb_flat = emb.reshape(B_pad * S_pad, E)          # flatten outside the kernel

    OUT_PAD = _round_up(output_dim, 128)              # lane-dense output block

    # Combined conv weight: [E, sum(fs)*nf], column groups ordered (filter_size, j).
    w_cols, col_offsets, off = [], [], 0
    for (w, _), fs in zip(params["convs"], filter_sizes):
        col_offsets.append(off)
        for j in range(fs):
            w_cols.append(w[:, 0, j, :].T)            # [E, n_filters]
        off += fs * nf
    W_conv = jnp.concatenate(w_cols, axis=1).astype(compute_dtype)

    conv_biases = [b[None, :].astype(jnp.float32) for (_, b) in params["convs"]]

    mlp_ws = [w.T.astype(compute_dtype) for (w, _) in params["mlp"]]
    mlp_bs = [b[None, :].astype(jnp.float32) for (_, b) in params["mlp"]]
    n_mlp = len(params["mlp"])

    # Final fc, split per branch (preserves PyTorch concat order: pooled..., mlp).
    fcw, fcb = params["fc"]
    cat_dim = fcw.shape[1]
    fcw_p = jnp.zeros((cat_dim, OUT_PAD), jnp.float32).at[:, :output_dim].set(fcw.T)
    fc_conv_ws = [fcw_p[i * nf:(i + 1) * nf, :].astype(compute_dtype)
                  for i in range(n_conv)]
    fc_mlp_w = fcw_p[n_conv * nf:, :].astype(compute_dtype)
    fc_b_p = jnp.zeros((1, OUT_PAD), jnp.float32).at[:, :output_dim].set(fcb[None, :])

    kernel_inputs = [emb_flat, n, W_conv] + conv_biases
    for w, b in zip(mlp_ws, mlp_bs):
        kernel_inputs += [w, b]
    kernel_inputs += fc_conv_ws + [fc_mlp_w, fc_b_p]

    def batch_map(b):
        return (b, 0)

    def const_map(b):
        return (0, 0)

    in_specs = [pl.BlockSpec((BM * S_pad, E), batch_map),
                pl.BlockSpec((BM, F_in), batch_map)]
    for arr in kernel_inputs[2:]:
        in_specs.append(pl.BlockSpec(arr.shape, const_map))

    kern = make_kernel(filter_sizes, n_filters, n_mlp, S, S_pad,
                       tuple(col_offsets), compute_dtype)
    out = pl.pallas_call(
        kern,
        grid=(B_pad // BM,),
        in_specs=in_specs,
        out_specs=pl.BlockSpec((BM, OUT_PAD), batch_map),
        out_shape=jax.ShapeDtypeStruct((B_pad, OUT_PAD), jnp.float32),
        compiler_params=pltpu.CompilerParams(dimension_semantics=("parallel",)),
    )(*kernel_inputs)
    return out[:B, :output_dim]                       # [B, output_dim]


def reference_forward(text, nums, params, filter_sizes):
    """Pure-JAX f32 reference replicating the PyTorch forward (eval mode)."""
    t = text.T
    n = nums.T.astype(jnp.float32)
    emb = params["emb"][t].astype(jnp.float32)        # [B, S, E]
    S = emb.shape[1]
    pooled = []
    for (w, bvec), fs in zip(params["convs"], filter_sizes):
        L = S - fs + 1
        conv = jnp.stack(
            [jnp.einsum("bje,fje->bf", emb[:, t0:t0 + fs, :], w[:, 0]) for t0 in range(L)],
            axis=2) + bvec[None, :, None]
        conv = jnp.maximum(conv, 0.0)
        pooled.append(jnp.max(conv, axis=2))
    cat = jnp.concatenate(pooled, axis=1)
    h = n
    for w, bvec in params["mlp"]:
        h = jnp.maximum(h @ w.T + bvec, 0.0)
    cat = jnp.concatenate([cat, h], axis=1)
    fcw, fcb = params["fc"]
    return cat @ fcw.T + fcb


if __name__ == "__main__":
    # Module hyper-parameters (small, consistent with the forward pass).
    vocab_size = 50
    output_dim = 4
    embedding_dim = 32
    n_filters = 4
    filter_sizes = (2, 3)
    linear_sizes = (8, 16, 16)
    pad_idx = 0
    seq_len, batch = 8, 2

    key = jax.random.PRNGKey(0)
    keys = jax.random.split(key, 16)

    # Deterministic parameter init (PyTorch shapes).
    emb_table = 0.1 * jax.random.normal(keys[0], (vocab_size, embedding_dim), jnp.float32)
    emb_table = emb_table.at[pad_idx].set(0.0)        # padding_idx row is zero

    convs = []
    for i, fs in enumerate(filter_sizes):
        w = 0.1 * jax.random.normal(keys[1 + i], (n_filters, 1, fs, embedding_dim), jnp.float32)
        b = 0.1 * jax.random.normal(keys[5 + i], (n_filters,), jnp.float32)
        convs.append((w, b))

    mlp = []
    for i, (din, dout) in enumerate(zip(linear_sizes[:-1], linear_sizes[1:])):
        w = 0.1 * jax.random.normal(keys[8 + i], (dout, din), jnp.float32)
        b = 0.1 * jax.random.normal(keys[11 + i], (dout,), jnp.float32)
        mlp.append((w, b))

    cat_dim = len(filter_sizes) * n_filters + linear_sizes[-1]
    fc_w = 0.1 * jax.random.normal(keys[14], (output_dim, cat_dim), jnp.float32)
    fc_b = 0.1 * jax.random.normal(keys[15], (output_dim,), jnp.float32)

    params = {"emb": emb_table, "convs": convs, "mlp": mlp, "fc": (fc_w, fc_b)}

    # Inputs in PyTorch convention: text [seq, batch] ints, nums [feat, batch] floats.
    text = jax.random.randint(jax.random.PRNGKey(1), (seq_len, batch), 0, vocab_size, jnp.int32)
    nums = jax.random.normal(jax.random.PRNGKey(2), (linear_sizes[0], batch), jnp.float32)

    ref = reference_forward(text, nums, params, filter_sizes)

    # Strict correctness check with f32 matmul inputs.
    out_f32 = cnn_plus_mlp_forward(text, nums, params, filter_sizes, n_filters,
                                   output_dim, compute_dtype=jnp.float32)
    out_f32 = jax.block_until_ready(out_f32)
    assert out_f32.shape == (batch, output_dim)
    assert jnp.allclose(out_f32, ref, atol=1e-4, rtol=1e-4), (out_f32, ref)

    # Default optimized path: bf16 matmul inputs, f32 accumulation/elementwise.
    out_bf16 = cnn_plus_mlp_forward(text, nums, params, filter_sizes, n_filters,
                                    output_dim)
    out_bf16 = jax.block_until_ready(out_bf16)
    assert out_bf16.shape == (batch, output_dim)
    assert jnp.allclose(out_bf16, ref, atol=5e-2, rtol=5e-2), (out_bf16, ref)

    print("KERNEL_OK")
</pallas_src>

<mosaic_0001>
module attributes {stable_mosaic.version = 11 : i64} {
  func.func @kernel(%arg0: i32, %arg1: memref<64x32xf32, #tpu.memory_space<vmem>>, %arg2: memref<8x8xf32, #tpu.memory_space<vmem>>, %arg3: memref<32x20xf32, #tpu.memory_space<vmem>>, %arg4: memref<1x4xf32, #tpu.memory_space<vmem>>, %arg5: memref<1x4xf32, #tpu.memory_space<vmem>>, %arg6: memref<8x16xf32, #tpu.memory_space<vmem>>, %arg7: memref<1x16xf32, #tpu.memory_space<vmem>>, %arg8: memref<16x16xf32, #tpu.memory_space<vmem>>, %arg9: memref<1x16xf32, #tpu.memory_space<vmem>>, %arg10: memref<4x128xf32, #tpu.memory_space<vmem>>, %arg11: memref<4x128xf32, #tpu.memory_space<vmem>>, %arg12: memref<16x128xf32, #tpu.memory_space<vmem>>, %arg13: memref<1x128xf32, #tpu.memory_space<vmem>>, %arg14: memref<8x128xf32, #tpu.memory_space<vmem>>) attributes {dimension_semantics = [#tpu.dimension_semantics<parallel>], iteration_bounds = array<i64: 1>, scalar_prefetch = 0 : i64, scratch_operands = 0 : i64, tpu.core_type = #tpu.core_type<tc>, window_params = [{transform_indices = @transform_0, window_bounds = array<i64: 64, 32>}, {transform_indices = @transform_1, window_bounds = array<i64: 8, 8>}, {pipeline_mode = #tpu.pipeline_mode<synchronous>, transform_indices = @transform_2, window_bounds = array<i64: 32, 20>}, {pipeline_mode = #tpu.pipeline_mode<synchronous>, transform_indices = @transform_3, window_bounds = array<i64: 1, 4>}, {pipeline_mode = #tpu.pipeline_mode<synchronous>, transform_indices = @transform_4, window_bounds = array<i64: 1, 4>}, {pipeline_mode = #tpu.pipeline_mode<synchronous>, transform_indices = @transform_5, window_bounds = array<i64: 8, 16>}, {pipeline_mode = #tpu.pipeline_mode<synchronous>, transform_indices = @transform_6, window_bounds = array<i64: 1, 16>}, {pipeline_mode = #tpu.pipeline_mode<synchronous>, transform_indices = @transform_7, window_bounds = array<i64: 16, 16>}, {pipeline_mode = #tpu.pipeline_mode<synchronous>, transform_indices = @transform_8, window_bounds = array<i64: 1, 16>}, {pipeline_mode = #tpu.pipeline_mode<synchronous>, transform_indices = @transform_9, window_bounds = array<i64: 4, 128>}, {pipeline_mode = #tpu.pipeline_mode<synchronous>, transform_indices = @transform_10, window_bounds = array<i64: 4, 128>}, {pipeline_mode = #tpu.pipeline_mode<synchronous>, transform_indices = @transform_11, window_bounds = array<i64: 16, 128>}, {pipeline_mode = #tpu.pipeline_mode<synchronous>, transform_indices = @transform_12, window_bounds = array<i64: 1, 128>}, {transform_indices = @transform_13, window_bounds = array<i64: 8, 128>}]} {
    %c0 = arith.constant 0 : index
    %c0_0 = arith.constant 0 : index
    %0 = vector.load %arg1[%c0, %c0_0] : memref<64x32xf32, #tpu.memory_space<vmem>>, vector<64x32xf32>
    %c0_1 = arith.constant 0 : index
    %c0_2 = arith.constant 0 : index
    %1 = vector.load %arg3[%c0_1, %c0_2] : memref<32x20xf32, #tpu.memory_space<vmem>>, vector<32x20xf32>
    %cst = arith.constant dense<0.000000e+00> : vector<64x20xf32>
    %2 = tpu.matmul %0, %1, %cst {dimension_numbers = #tpu.dot_dimension_numbers<[1], [0], [0], [1], [0, 0, 1, 1], [], []>} : vector<64x32xf32>, vector<32x20xf32>, vector<64x20xf32> -> vector<64x20xf32>
    %3 = vector.shape_cast %2 : vector<64x20xf32> to vector<8x8x20xf32>
    %cst_3 = arith.constant 0.000000e+00 : f32
    %4 = vector.broadcast %cst_3 : f32 to vector<8x128xf32>
    %5 = vector.extract_strided_slice %3 {offsets = [0, 0, 0], sizes = [8, 7, 4], strides = [1, 1, 1]} : vector<8x8x20xf32> to vector<8x7x4xf32>
    %6 = vector.extract_strided_slice %3 {offsets = [0, 1, 4], sizes = [8, 7, 4], strides = [1, 1, 1]} : vector<8x8x20xf32> to vector<8x7x4xf32>
    %7 = arith.addf %5, %6 : vector<8x7x4xf32>
    %c0_4 = arith.constant 0 : index
    %c0_5 = arith.constant 0 : index
    %8 = vector.load %arg4[%c0_4, %c0_5] : memref<1x4xf32, #tpu.memory_space<vmem>>, vector<1x4xf32>
    %9 = vector.shape_cast %8 : vector<1x4xf32> to vector<1x1x4xf32>
    %10 = vector.broadcast %9 : vector<1x1x4xf32> to vector<8x7x4xf32>
    %11 = arith.addf %7, %10 : vector<8x7x4xf32>
    %cst_6 = arith.constant 0.000000e+00 : f32
    %12 = vector.broadcast %cst_6 : f32 to vector<8x7x4xf32>
    %13 = arith.maximumf %11, %12 : vector<8x7x4xf32>
    %cst_7 = arith.constant dense<0xFF800000> : vector<8x4xf32>
    %14 = vector.multi_reduction <maximumf>, %13, %cst_7 [1] : vector<8x7x4xf32> to vector<8x4xf32>
    %c0_8 = arith.constant 0 : index
    %c0_9 = arith.constant 0 : index
    %15 = vector.load %arg10[%c0_8, %c0_9] : memref<4x128xf32, #tpu.memory_space<vmem>>, vector<4x128xf32>
    %cst_10 = arith.constant dense<0.000000e+00> : vector<8x128xf32>
    %16 = tpu.matmul %14, %15, %cst_10 {dimension_numbers = #tpu.dot_dimension_numbers<[1], [0], [0], [1], [0, 0, 1, 1], [], []>} : vector<8x4xf32>, vector<4x128xf32>, vector<8x128xf32> -> vector<8x128xf32>
    %17 = arith.addf %4, %16 : vector<8x128xf32>
    %18 = vector.extract_strided_slice %3 {offsets = [0, 0, 8], sizes = [8, 6, 4], strides = [1, 1, 1]} : vector<8x8x20xf32> to vector<8x6x4xf32>
    %19 = vector.extract_strided_slice %3 {offsets = [0, 1, 12], sizes = [8, 6, 4], strides = [1, 1, 1]} : vector<8x8x20xf32> to vector<8x6x4xf32>
    %20 = arith.addf %18, %19 : vector<8x6x4xf32>
    %21 = vector.extract_strided_slice %3 {offsets = [0, 2, 16], sizes = [8, 6, 4], strides = [1, 1, 1]} : vector<8x8x20xf32> to vector<8x6x4xf32>
    %22 = arith.addf %20, %21 : vector<8x6x4xf32>
    %c0_11 = arith.constant 0 : index
    %c0_12 = arith.constant 0 : index
    %23 = vector.load %arg5[%c0_11, %c0_12] : memref<1x4xf32, #tpu.memory_space<vmem>>, vector<1x4xf32>
    %24 = vector.shape_cast %23 : vector<1x4xf32> to vector<1x1x4xf32>
    %25 = vector.broadcast %24 : vector<1x1x4xf32> to vector<8x6x4xf32>
    %26 = arith.addf %22, %25 : vector<8x6x4xf32>
    %cst_13 = arith.constant 0.000000e+00 : f32
    %27 = vector.broadcast %cst_13 : f32 to vector<8x6x4xf32>
    %28 = arith.maximumf %26, %27 : vector<8x6x4xf32>
    %cst_14 = arith.constant dense<0xFF800000> : vector<8x4xf32>
    %29 = vector.multi_reduction <maximumf>, %28, %cst_14 [1] : vector<8x6x4xf32> to vector<8x4xf32>
    %c0_15 = arith.constant 0 : index
    %c0_16 = arith.constant 0 : index
    %30 = vector.load %arg11[%c0_15, %c0_16] : memref<4x128xf32, #tpu.memory_space<vmem>>, vector<4x128xf32>
    %cst_17 = arith.constant dense<0.000000e+00> : vector<8x128xf32>
    %31 = tpu.matmul %29, %30, %cst_17 {dimension_numbers = #tpu.dot_dimension_numbers<[1], [0], [0], [1], [0, 0, 1, 1], [], []>} : vector<8x4xf32>, vector<4x128xf32>, vector<8x128xf32> -> vector<8x128xf32>
    %32 = arith.addf %17, %31 : vector<8x128xf32>
    %c0_18 = arith.constant 0 : index
    %c0_19 = arith.constant 0 : index
    %33 = vector.load %arg2[%c0_18, %c0_19] : memref<8x8xf32, #tpu.memory_space<vmem>>, vector<8x8xf32>
    %c0_20 = arith.constant 0 : index
    %c0_21 = arith.constant 0 : index
    %34 = vector.load %arg6[%c0_20, %c0_21] : memref<8x16xf32, #tpu.memory_space<vmem>>, vector<8x16xf32>
    %cst_22 = arith.constant dense<0.000000e+00> : vector<8x16xf32>
    %35 = tpu.matmul %33, %34, %cst_22 {dimension_numbers = #tpu.dot_dimension_numbers<[1], [0], [0], [1], [0, 0, 1, 1], [], []>} : vector<8x8xf32>, vector<8x16xf32>, vector<8x16xf32> -> vector<8x16xf32>
    %c0_23 = arith.constant 0 : index
    %c0_24 = arith.constant 0 : index
    %36 = vector.load %arg7[%c0_23, %c0_24] : memref<1x16xf32, #tpu.memory_space<vmem>>, vector<1x16xf32>
    %37 = vector.broadcast %36 : vector<1x16xf32> to vector<8x16xf32>
    %38 = arith.addf %35, %37 : vector<8x16xf32>
    %cst_25 = arith.constant 0.000000e+00 : f32
    %39 = vector.broadcast %cst_25 : f32 to vector<8x16xf32>
    %40 = arith.maximumf %38, %39 : vector<8x16xf32>
    %c0_26 = arith.constant 0 : index
    %c0_27 = arith.constant 0 : index
    %41 = vector.load %arg8[%c0_26, %c0_27] : memref<16x16xf32, #tpu.memory_space<vmem>>, vector<16x16xf32>
    %cst_28 = arith.constant dense<0.000000e+00> : vector<8x16xf32>
    %42 = tpu.matmul %40, %41, %cst_28 {dimension_numbers = #tpu.dot_dimension_numbers<[1], [0], [0], [1], [0, 0, 1, 1], [], []>} : vector<8x16xf32>, vector<16x16xf32>, vector<8x16xf32> -> vector<8x16xf32>
    %c0_29 = arith.constant 0 : index
    %c0_30 = arith.constant 0 : index
    %43 = vector.load %arg9[%c0_29, %c0_30] : memref<1x16xf32, #tpu.memory_space<vmem>>, vector<1x16xf32>
    %44 = vector.broadcast %43 : vector<1x16xf32> to vector<8x16xf32>
    %45 = arith.addf %42, %44 : vector<8x16xf32>
    %cst_31 = arith.constant 0.000000e+00 : f32
    %46 = vector.broadcast %cst_31 : f32 to vector<8x16xf32>
    %47 = arith.maximumf %45, %46 : vector<8x16xf32>
    %c0_32 = arith.constant 0 : index
    %c0_33 = arith.constant 0 : index
    %48 = vector.load %arg12[%c0_32, %c0_33] : memref<16x128xf32, #tpu.memory_space<vmem>>, vector<16x128xf32>
    %cst_34 = arith.constant dense<0.000000e+00> : vector<8x128xf32>
    %49 = tpu.matmul %47, %48, %cst_34 {dimension_numbers = #tpu.dot_dimension_numbers<[1], [0], [0], [1], [0, 0, 1, 1], [], []>} : vector<8x16xf32>, vector<16x128xf32>, vector<8x128xf32> -> vector<8x128xf32>
    %50 = arith.addf %32, %49 : vector<8x128xf32>
    %c0_35 = arith.constant 0 : index
    %c0_36 = arith.constant 0 : index
    %51 = vector.load %arg13[%c0_35, %c0_36] : memref<1x128xf32, #tpu.memory_space<vmem>>, vector<1x128xf32>
    %52 = vector.broadcast %51 : vector<1x128xf32> to vector<8x128xf32>
    %53 = arith.addf %50, %52 : vector<8x128xf32>
    %c0_37 = arith.constant 0 : index
    %c0_38 = arith.constant 0 : index
    %54 = vector.load %arg14[%c0_37, %c0_38] : memref<8x128xf32, #tpu.memory_space<vmem>>, vector<8x128xf32>
    tpu.vector_store %arg14[%c0_37, %c0_38], %53 {strides = array<i32>} : memref<8x128xf32, #tpu.memory_space<vmem>>, vector<8x128xf32>,
    return
  }
  func.func @transform_0(%arg0: i32) -> (i32, i32) {
    %c0_i32 = arith.constant 0 : i32
    %c0_i32_0 = arith.constant 0 : i32
    return %arg0, %c0_i32 : i32, i32
  }
  func.func @transform_1(%arg0: i32) -> (i32, i32) {
    %c0_i32 = arith.constant 0 : i32
    %c0_i32_0 = arith.constant 0 : i32
    return %arg0, %c0_i32 : i32, i32
  }
  func.func @transform_2(%arg0: i32) -> (i32, i32) {
    %c0_i32 = arith.constant 0 : i32
    %c0_i32_0 = arith.constant 0 : i32
    %c0_i32_1 = arith.constant 0 : i32
    return %c0_i32, %c0_i32_0 : i32, i32
  }
  func.func @transform_3(%arg0: i32) -> (i32, i32) {
    %c0_i32 = arith.constant 0 : i32
    %c0_i32_0 = arith.constant 0 : i32
    %c0_i32_1 = arith.constant 0 : i32
    return %c0_i32, %c0_i32_0 : i32, i32
  }
  func.func @transform_4(%arg0: i32) -> (i32, i32) {
    %c0_i32 = arith.constant 0 : i32
    %c0_i32_0 = arith.constant 0 : i32
    %c0_i32_1 = arith.constant 0 : i32
    return %c0_i32, %c0_i32_0 : i32, i32
  }
  func.func @transform_5(%arg0: i32) -> (i32, i32) {
    %c0_i32 = arith.constant 0 : i32
    %c0_i32_0 = arith.constant 0 : i32
    %c0_i32_1 = arith.constant 0 : i32
    return %c0_i32, %c0_i32_0 : i32, i32
  }
  func.func @transform_6(%arg0: i32) -> (i32, i32) {
    %c0_i32 = arith.constant 0 : i32
    %c0_i32_0 = arith.constant 0 : i32
    %c0_i32_1 = arith.constant 0 : i32
    return %c0_i32, %c0_i32_0 : i32, i32
  }
  func.func @transform_7(%arg0: i32) -> (i32, i32) {
    %c0_i32 = arith.constant 0 : i32
    %c0_i32_0 = arith.constant 0 : i32
    %c0_i32_1 = arith.constant 0 : i32
    return %c0_i32, %c0_i32_0 : i32, i32
  }
  func.func @transform_8(%arg0: i32) -> (i32, i32) {
    %c0_i32 = arith.constant 0 : i32
    %c0_i32_0 = arith.constant 0 : i32
    %c0_i32_1 = arith.constant 0 : i32
    return %c0_i32, %c0_i32_0 : i32, i32
  }
  func.func @transform_9(%arg0: i32) -> (i32, i32) {
    %c0_i32 = arith.constant 0 : i32
    %c0_i32_0 = arith.constant 0 : i32
    %c0_i32_1 = arith.constant 0 : i32
    return %c0_i32, %c0_i32_0 : i32, i32
  }
  func.func @transform_10(%arg0: i32) -> (i32, i32) {
    %c0_i32 = arith.constant 0 : i32
    %c0_i32_0 = arith.constant 0 : i32
    %c0_i32_1 = arith.constant 0 : i32
    return %c0_i32, %c0_i32_0 : i32, i32
  }
  func.func @transform_11(%arg0: i32) -> (i32, i32) {
    %c0_i32 = arith.constant 0 : i32
    %c0_i32_0 = arith.constant 0 : i32
    %c0_i32_1 = arith.constant 0 : i32
    return %c0_i32, %c0_i32_0 : i32, i32
  }
  func.func @transform_12(%arg0: i32) -> (i32, i32) {
    %c0_i32 = arith.constant 0 : i32
    %c0_i32_0 = arith.constant 0 : i32
    %c0_i32_1 = arith.constant 0 : i32
    return %c0_i32, %c0_i32_0 : i32, i32
  }
  func.func @transform_13(%arg0: i32) -> (i32, i32) {
    %c0_i32 = arith.constant 0 : i32
    %c0_i32_0 = arith.constant 0 : i32
    return %arg0, %c0_i32 : i32, i32
  }
}

</mosaic_0001>

<bundles_post_ra>
// kernel: tpu_custom_call.1
= control target key start
LH: loop header
LB: loop body
LE: loop exit
PB: predicated region body
PF: predicated region fallthrough
CT: control target
= control target key end

     0   :  { %vm57_vm0 = vcmask 261120   ;;  %s1310_s0 = inlined_call_operand.vmem [shape: f32[64,32], index: 0, kind: input, shape index: {}]   ;;  %s1311_s1 = inlined_call_operand.vmem [shape: f32[8,8], index: 1, kind: input, shape index: {}]   ;;  %s1312_s2 = inlined_call_operand.vmem [shape: f32[32,20], index: 2, kind: input, shape index: {}]   ;;  %s1313_s3 = inlined_call_operand.vmem [shape: f32[1,4], index: 3, kind: input, shape index: {}]   ;;  %s1314_s4 = inlined_call_operand.vmem [shape: f32[1,4], index: 4, kind: input, shape index: {}]   ;;  %s1315_s5 = inlined_call_operand.vmem [shape: f32[8,16], index: 5, kind: input, shape index: {}]   ;;  %s1316_s6 = inlined_call_operand.vmem [shape: f32[1,16], index: 6, kind: input, shape index: {}]   ;;  %s1317_s7 = inlined_call_operand.vmem [shape: f32[16,16], index: 7, kind: input, shape index: {}]   ;;  %s1318_s8 = inlined_call_operand.vmem [shape: f32[1,16], index: 8, kind: input, shape index: {}]   ;;  %s1319_s9 = inlined_call_operand.vmem [shape: f32[4,128], index: 9, kind: input, shape index: {}]   ;;  %s1320_s10 = inlined_call_operand.vmem [shape: f32[4,128], index: 10, kind: input, shape index: {}]   ;;  %s1321_s11 = inlined_call_operand.vmem [shape: f32[16,128], index: 11, kind: input, shape index: {}]   ;;  %s1322_s12 = inlined_call_operand.vmem [shape: f32[1,128], index: 12, kind: input, shape index: {}]   ;;  %s1323_s13 = inlined_call_operand.hbm [shape: f32[8,128], index: 13, kind: output, shape index: {}]  }
   0x1   :  { %v53_v0 = vld [vmem:[%s1312_s2] sm:$0xff]  ;;  %v54_v1 = vld [vmem:[%s1312_s2 + $0x8] sm:$0xff]  ;;  %v55_v2 = vld [vmem:[%s1312_s2 + $0x10] sm:$0xff] }
   0x2   :  { %v990_v3 = vpack.c.bf16 %v54_v1, %v53_v0  ;;  %v56_v4 = vld [vmem:[%s1312_s2 + $0x18] sm:$0xff]  ;;  %v45_v5 = vld [vmem:[%s1310_s0] sm:$0xff] }
   0x3   :  { %v994_v6 = vpack.c.bf16 %v56_v4, %v55_v2  ;;  %949 = vmatprep.mubr.msk.f32.mxu0 %vm57_vm0, %v45_v5  ;;  %v906_v7 = vld [vmem:[%s1314_s4] ss:$0 sm:$0xff] }
   0x4   :  { %991 = vmatprep.subr.bf16.mxu0 %v990_v3 }
   0x5   :  { %993 = vmatpush3.bf16.msra.mxu0 %v990_v3 }
   0x6   :  { %18 = vsyncpa [#allocation3], 0  ;;  %995 = vmatprep.subr.bf16.mxu0 %v994_v6  ;;  %s1035_s20 = smov 8   ;;  %v46_v8 = vld [vmem:[%s1310_s0 + $0x8] sm:$0xff]  ;;  %v47_v9 = vld [vmem:[%s1310_s0 + $0x10] sm:$0xff]  ;;  %s1036_s16 = smov 120  }
   0x7   :  { %362 = vrot.lane.b32.xlu0 %v906_v7, %s1035_s20  ;;  %v48_v10 = vld [vmem:[%s1310_s0 + $0x18] sm:$0xff]  ;;  %v49_v11 = vld [vmem:[%s1310_s0 + $0x20] sm:$0xff]  ;;  %v50_v12 = vld [vmem:[%s1310_s0 + $0x28] sm:$0xff]  ;;  %s1037_s17 = smov 124   ;;  %vm466_vm1 = vcmask 1043456   ;;  %v1038_v40 = vmov 0.0  }
   0x8   :  { %v51_v13 = vld [vmem:[%s1310_s0 + $0x30] sm:$0xff]  ;;  %v52_v14 = vld [vmem:[%s1310_s0 + $0x38] sm:$0xff]  ;;  %v438_v39 = vld [vmem:[%s1320_s10] sm:$0xf]  ;;  %961 = vmatprep.subr.mxu1 %v1038_v40  ;;  %vm1039_vm2 = vmmov 0   ;;  %vm258_vm3 = vcmask 30720  }
   0x9   :  { %997 = vmatpush3.bf16.msra.mxu0 %v994_v6  ;;  %963 = vmatprep.mubr.msk.f32.mxu1 %vm1039_vm2, %v1038_v40  ;;  %v1208_v43 = vld [vmem:[%s1313_s3] ss:$0 sm:$0xff]  ;;  %vm381_vm4 = vcmask 95296   ;;  %vm447_vm5 = vcmask 1041409   ;;  %vm449_vm6 = vcmask 1042434   ;;  %vm451_vm7 = vcmask 1043459  }
   0xa   :  { %962 = vmatpush3.msk.msra.mxu1 %vm466_vm1, %v438_v39  ;;  %vm453_vm8 = vcmask 1044484   ;;  %vm455_vm9 = vcmask 1045509   ;;  %vm457_vm10 = vcmask 1046534   ;;  %vm459_vm11 = vcmask 1047559   ;;  %s1041_s15 = smov [#allocation2]  }
   0xb   :  { %966 = vmatprep.subr.mxu1 %v1038_v40  ;;  %vm463_vm12 = vcmask 31744   ;;  %vm639_vm13 = vcmask 64512   ;;  %vm723_vm14 = vcmask 130048  }
   0xc   :  { %950 = vmatmul.mubr.msk.f32.vlgmr.msra.gmra.mrb[0].mxu0 %vm57_vm0, %v46_v8 }
   0xd   :  { %952 = vmatprep.mubr.msk.f32.mxu0 %vm57_vm0, %v47_v9 }
  0x10   :  { %953 = vmatmul.mubr.msk.f32.gmra.mrb[2].mxu0 %vm57_vm0, %v48_v10 }
  0x11   :  { %955 = vmatprep.mubr.msk.f32.mxu0 %vm57_vm0, %v49_v11 }
  0x14   :  { %956 = vmatmul.mubr.msk.f32.gmra.mrb[4].mxu0 %vm57_vm0, %v50_v12 }
  0x15   :  { %958 = vmatprep.mubr.msk.f32.mxu0 %vm57_vm0, %v51_v13 }
  0x18   :  { %959 = vmatmul.mubr.msk.f32.gmra.mrb[6].mxu0 %vm57_vm0, %v52_v14 }
  0x79   :  { %v1203_v41 = vpop.permute.xlu0 %362 }
  0xdf   :  { %v951_v15 = vpop.f32.mrb[0].mxu0 }
  0xe0   :  { %v196_v16 = vrot.slane %v951_v15, 1  ;;  %v148_v17 = vpop.f32.mrb[1].mxu0  ;;  %v317_v18 = vrot.slane %v951_v15, 2 }
  0xe1   :  { %v195_v20 = vrot.slane %v148_v17, 1  ;;  %v316_v24 = vrot.slane %v148_v17, 2 }
  0xe2   :  { %326 = vrot.lane.b32.xlu1 %v317_v18, %s1036_s16  ;;  %205 = vrot.lane.b32.xlu0 %v196_v16, %s1037_s17 }
  0xe3   :  { %v954_v19 = vpop.f32.mrb[2].mxu0 }
  0xe4   :  { %v198_v21 = vrot.slane %v954_v19, 1  ;;  %v1161_v22 = vpop.f32.mrb[3].mxu0  ;;  %v319_v25 = vrot.slane %v954_v19, 2 }
  0xe5   :  { %v197_v29 = vrot.slane %v1161_v22, 1  ;;  %v318_v31 = vrot.slane %v1161_v22, 2 }
  0xe6   :  { %203 = vrot.lane.b32.xlu0 %v195_v20, %s1037_s17  ;;  %209 = vrot.lane.b32.xlu1 %v198_v21, %s1037_s17 }
  0xe7   :  { %v1165_v23 = vpop.f32.mrb[4].mxu0 }
  0xe8   :  { %v1167_v26 = vpop.f32.mrb[5].mxu0  ;;  %v200_v27 = vrot.slane %v1165_v23, 1  ;;  %v321_v32 = vrot.slane %v1165_v23, 2 }
  0xe9   :  { %v199_v34 = vrot.slane %v1167_v26, 1  ;;  %v320_v35 = vrot.slane %v1167_v26, 2 }
  0xea   :  { %324 = vrot.lane.b32.xlu0 %v316_v24, %s1036_s16  ;;  %330 = vrot.lane.b32.xlu1 %v319_v25, %s1036_s16 }
  0xeb   :  { %v1172_v28 = vpop.f32.mrb[6].mxu0 }
  0xec   :  { %v1175_v30 = vpop.f32.mrb[7].mxu0  ;;  %v202_v33 = vrot.slane %v1172_v28, 1  ;;  %v323_v37 = vrot.slane %v1172_v28, 2 }
  0xed   :  { %v201_v36 = vrot.slane %v1175_v30, 1  ;;  %v322_v38 = vrot.slane %v1175_v30, 2 }
  0xee   :  { %207 = vrot.lane.b32.xlu1 %v197_v29, %s1037_s17  ;;  %213 = vrot.lane.b32.xlu0 %v200_v27, %s1037_s17 }
  0xf2   :  { %328 = vrot.lane.b32.xlu1 %v318_v31, %s1036_s16  ;;  %334 = vrot.lane.b32.xlu0 %v321_v32, %s1036_s16 }
  0xf6   :  { %211 = vrot.lane.b32.xlu0 %v199_v34, %s1037_s17  ;;  %217 = vrot.lane.b32.xlu1 %v202_v33, %s1037_s17 }
  0xfa   :  { %332 = vrot.lane.b32.xlu0 %v320_v35, %s1036_s16  ;;  %215 = vrot.lane.b32.xlu1 %v201_v36, %s1037_s17 }
  0xfe   :  { %338 = vrot.lane.b32.xlu0 %v323_v37, %s1036_s16  ;;  %336 = vrot.lane.b32.xlu1 %v322_v38, %s1036_s16 }
 0x154   :  { %v327_v42 = vpop.permute.xlu1 %326  ;;  %v206_v44 = vpop.permute.xlu0 %205 }
 0x155   :  { %v228_v45 = vadd.f32 %v951_v15, %v206_v44 }
 0x157   :  { %v243_v46 = vadd.f32 %v1208_v43, %v228_v45  ;;  %v349_v47 = vadd.f32 %v327_v42, %v228_v45 }
 0x158   :  { %v204_v48 = vpop.permute.xlu0 %203  ;;  %v210_v49 = vpop.permute.xlu1 %209 }
 0x159   :  { %v251_v50 = vmax.f32 %v243_v46, 0.0  ;;  %v366_v51 = vadd.f32 %v1203_v41, %v349_v47  ;;  %v227_v52 = vadd.f32 %v204_v48, %v148_v17  ;;  %v230_v53 = vadd.f32 %v954_v19, %v210_v49 }
 0x15b   :  { %v266_v54 = vsel %vm258_vm3, %v251_v50, -inf  ;;  %v374_v55 = vmax.f32 %v366_v51, 0.0  ;;  %v242_v56 = vadd.f32 %v1208_v43, %v227_v52  ;;  %v245_v57 = vadd.f32 %v1208_v43, %v230_v53 }
 0x15c   :  { %v267_v58 = vrot.slane %v266_v54, 4  ;;  %v325_v59 = vpop.permute.xlu0 %324  ;;  %v331_v60 = vpop.permute.xlu1 %330 }
 0x15d   :  { %v389_v61 = vsel %vm381_vm4, %v374_v55, -inf  ;;  %v250_v62 = vmax.f32 %v242_v56, 0.0  ;;  %v253_v63 = vmax.f32 %v245_v57, 0.0  ;;  %v348_v0 = vadd.f32 %v325_v59, %v227_v52 }
 0x15e   :  { %v268_v1 = vmax.f32 %v266_v54, %v267_v58  ;;  %v390_v2 = vrot.slane %v389_v61, 4  ;;  %v351_v3 = vadd.f32 %v331_v60, %v230_v53 }
 0x15f   :  { %v259_v4 = vsel %vm258_vm3, %v250_v62, -inf  ;;  %v280_v5 = vsel %vm258_vm3, %v253_v63, -inf  ;;  %v365_v6 = vadd.f32 %v1203_v41, %v348_v0 }
 0x160   :  { %v269_v7 = vrot.slane %v268_v1, 2  ;;  %v391_v8 = vmax.f32 %v389_v61, %v390_v2  ;;  %v260_v9 = vrot.slane %v259_v4, 4  ;;  %v281_v10 = vrot.slane %v280_v5, 4  ;;  %v208_v11 = vpop.permute.xlu1 %207  ;;  %v214_v12 = vpop.permute.xlu0 %213 }
 0x161   :  { %v373_v13 = vmax.f32 %v365_v6, 0.0  ;;  %v368_v14 = vadd.f32 %v1203_v41, %v351_v3  ;;  %v229_v15 = vadd.f32 %v208_v11, %v1161_v22  ;;  %v232_v16 = vadd.f32 %v1165_v23, %v214_v12 }
 0x162   :  { %v270_v17 = vmax.f32 %v268_v1, %v269_v7  ;;  %v392_v18 = vrot.slane %v391_v8, 2  ;;  %v261_v19 = vmax.f32 %v259_v4, %v260_v9  ;;  %v282_v20 = vmax.f32 %v280_v5, %v281_v10 }
 0x163   :  { %v382_v21 = vsel %vm381_vm4, %v373_v13, -inf  ;;  %v376_v24 = vmax.f32 %v368_v14, 0.0  ;;  %v244_v25 = vadd.f32 %v1208_v43, %v229_v15  ;;  %v247_v27 = vadd.f32 %v1208_v43, %v232_v16 }
 0x164   :  { %v271_v29 = vrot.slane %v270_v17, 1  ;;  %v262_v31 = vrot.slane %v261_v19, 2  ;;  %v283_v32 = vrot.slane %v282_v20, 2  ;;  %v329_v33 = vpop.permute.xlu1 %328  ;;  %v335_v34 = vpop.permute.xlu0 %334  ;;  %v383_v35 = vrot.slane %v382_v21, 4 }
 0x165   :  { %v403_v22 = vsel %vm381_vm4, %v376_v24, -inf  ;;  %v252_v23 = vmax.f32 %v244_v25, 0.0  ;;  %v255_v36 = vmax.f32 %v247_v27, 0.0  ;;  %v393_v37 = vmax.f32 %v391_v8, %v392_v18 }
 0x166   :  { %v263_v38 = vmax.f32 %v261_v19, %v262_v31  ;;  %v384_v39 = vmax.f32 %v382_v21, %v383_v35  ;;  %v404_v42 = vrot.slane %v403_v22, 4  ;;  %v272_v46 = vmax.f32 %v270_v17, %v271_v29 }
 0x167   :  { %v273_v44 = vsel %vm258_vm3, %v252_v23, -inf  ;;  %v294_v45 = vsel %vm258_vm3, %v255_v36, -inf  ;;  %v284_v48 = vmax.f32 %v282_v20, %v283_v32  ;;  %v350_v55 = vadd.f32 %v329_v33, %v229_v15 }
 0x168   :  { %v264_v47 = vrot.slane %v263_v38, 1  ;;  %v274_v49 = vrot.slane %v273_v44, 4  ;;  %v212_v50 = vpop.permute.xlu0 %211  ;;  %v218_v51 = vpop.permute.xlu1 %217  ;;  %v385_v52 = vrot.slane %v384_v39, 2  ;;  %v405_v53 = vmax.f32 %v403_v22, %v404_v42 }
 0x169   :  { %v295_v54 = vrot.slane %v294_v45, 4  ;;  %v394_v56 = vrot.slane %v393_v37, 1  ;;  %v353_v59 = vadd.f32 %v335_v34, %v232_v16  ;;  %v367_v63 = vadd.f32 %v1203_v41, %v350_v55 }
 0x16a   :  { %v265_v57 = vmax.f32 %v263_v38, %v264_v47  ;;  %v275_v58 = vmax.f32 %v273_v44, %v274_v49  ;;  %v386_v60 = vmax.f32 %v384_v39, %v385_v52  ;;  %v406_v61 = vrot.slane %v405_v53, 2 }
 0x16b   :  { %v296_v62 = vmax.f32 %v294_v45, %v295_v54  ;;  %v370_v2 = vadd.f32 %v1203_v41, %v353_v59  ;;  %v231_v3 = vadd.f32 %v212_v50, %v1167_v26  ;;  %v285_v5 = vrot.slane %v284_v48, 1 }
 0x16c   :  { %v548_v0 = vsel %vm447_vm5, %v272_v46, %v265_v57  ;;  %v276_v1 = vrot.slane %v275_v58, 2  ;;  %v333_v4 = vpop.permute.xlu0 %332  ;;  %v387_v6 = vrot.slane %v386_v60, 1  ;;  %v407_v7 = vmax.f32 %v405_v53, %v406_v61  ;;  %v216_v9 = vpop.permute.xlu1 %215 }
 0x16d   :  { %v375_v8 = vmax.f32 %v367_v63, 0.0  ;;  %v378_v11 = vmax.f32 %v370_v2, 0.0  ;;  %v246_v12 = vadd.f32 %v1208_v43, %v231_v3  ;;  %v234_v13 = vadd.f32 %v1172_v28, %v218_v51 }
 0x16e   :  { %v277_v10 = vmax.f32 %v275_v58, %v276_v1  ;;  %v395_v14 = vmax.f32 %v393_v37, %v394_v56  ;;  %v388_v15 = vmax.f32 %v386_v60, %v387_v6  ;;  %v297_v16 = vrot.slane %v296_v62, 2 }
 0x16f   :  { %v396_v17 = vsel %vm381_vm4, %v375_v8, -inf  ;;  %v417_v26 = vsel %vm381_vm4, %v378_v11, -inf  ;;  %v254_v20 = vmax.f32 %v246_v12, 0.0  ;;  %v286_v21 = vmax.f32 %v284_v48, %v285_v5 }
 0x170   :  { %v278_v18 = vrot.slane %v277_v10, 1  ;;  %v397_v19 = vrot.slane %v396_v17, 4  ;;  %v448_v24 = vsel %vm447_vm5, %v395_v14, %v388_v15  ;;  %v408_v25 = vrot.slane %v407_v7, 1  ;;  %v339_v33 = vpop.permute.xlu0 %338  ;;  %v337_v36 = vpop.permute.xlu1 %336 }
 0x171   :  { %v418_v27 = vrot.slane %v417_v26, 4  ;;  %v287_v32 = vsel %vm258_vm3, %v254_v20, -inf  ;;  %v249_v28 = vadd.f32 %v1208_v43, %v234_v13  ;;  %v298_v34 = vmax.f32 %v296_v62, %v297_v16 }
 0x172   :  { %v279_v29 = vmax.f32 %v277_v10, %v278_v18  ;;  %v398_v31 = vmax.f32 %v396_v17, %v397_v19  ;;  %v288_v22 = vrot.slane %v287_v32, 4  ;;  %v352_v23 = vadd.f32 %v333_v4, %v231_v3 }
 0x173   :  { %v419_v35 = vmax.f32 %v417_v26, %v418_v27  ;;  %v257_v39 = vmax.f32 %v249_v28, 0.0  ;;  %v233_v42 = vadd.f32 %v216_v9, %v1175_v30  ;;  %v409_v44 = vmax.f32 %v407_v7, %v408_v25 }
 0x174   :  { %v549_v37 = vsel %vm449_vm6, %v279_v29, %v548_v0  ;;  %v399_v38 = vrot.slane %v398_v31, 2  ;;  %v289_v45 = vmax.f32 %v287_v32, %v288_v22  ;;  %v369_v46 = vadd.f32 %v1203_v41, %v352_v23 }
 0x175   :  { %v355_v47 = vadd.f32 %v339_v33, %v234_v13  ;;  %v308_v49 = vsel %vm258_vm3, %v257_v39, -inf  ;;  %v248_v50 = vadd.f32 %v1208_v43, %v233_v42  ;;  %v354_v51 = vadd.f32 %v337_v36, %v233_v42 }
 0x176   :  { %v400_v48 = vmax.f32 %v398_v31, %v399_v38  ;;  %v420_v52 = vrot.slane %v419_v35, 2  ;;  %v290_v53 = vrot.slane %v289_v45, 2  ;;  %v309_v54 = vrot.slane %v308_v49, 4 }
 0x177   :  { %v377_v55 = vmax.f32 %v369_v46, 0.0  ;;  %v256_v57 = vmax.f32 %v248_v50, 0.0  ;;  %v372_v30 = vadd.f32 %v1203_v41, %v355_v47  ;;  %v371_v58 = vadd.f32 %v1203_v41, %v354_v51 }
 0x178   :  { %v401_v56 = vrot.slane %v400_v48, 1  ;;  %v299_v59 = vrot.slane %v298_v34, 1  ;;  %v291_v60 = vmax.f32 %v289_v45, %v290_v53  ;;  %v310_v61 = vmax.f32 %v308_v49, %v309_v54  ;;  %v631_v54 = vld [vmem:[%s1315_s5] sm:$0xff] }
 0x179   :  { %v410_v62 = vsel %vm381_vm4, %v377_v55, -inf  ;;  %v301_v43 = vsel %vm258_vm3, %v256_v57, -inf  ;;  %v380_v1 = vmax.f32 %v372_v30, 0.0  ;;  %v421_v2 = vmax.f32 %v419_v35, %v420_v52  ;;  %v315_v52 = vld [vmem:[%s1319_s9] sm:$0xf]  ;;  %v715_v57 = vld [vmem:[%s1317_s7 + $0x8] sm:$0xff] }
 0x17a   :  { %v402_v63 = vmax.f32 %v400_v48, %v401_v56  ;;  %v411_v0 = vrot.slane %v410_v62, 4  ;;  %v292_v3 = vrot.slane %v291_v60, 1  ;;  %v311_v4 = vrot.slane %v310_v61, 2  ;;  %v630_v55 = vld [vmem:[%s1311_s1] sm:$0xff] }
 0x17b   :  { %v302_v5 = vrot.slane %v301_v43, 4  ;;  %v431_v7 = vsel %vm381_vm4, %v380_v1, -inf  ;;  %v379_v8 = vmax.f32 %v371_v58, 0.0  ;;  %v550_v16 = vsel %vm451_vm7, %v286_v21, %v549_v37  ;;  %v714_v56 = vld [vmem:[%s1317_s7] sm:$0xff] }
 0x17c   :  { %v412_v6 = vmax.f32 %v410_v62, %v411_v0  ;;  %v450_v41 = vsel %vm449_vm6, %v402_v63, %v448_v24  ;;  %v293_v9 = vmax.f32 %v291_v60, %v292_v3  ;;  %v312_v10 = vmax.f32 %v310_v61, %v311_v4  ;;  %v911_v0 = vld [vmem:[%s1316_s6] ss:$0 sm:$0xff] }
 0x17d   :  { %v303_v11 = vmax.f32 %v301_v43, %v302_v5  ;;  %v432_v12 = vrot.slane %v431_v7, 4  ;;  %v424_v14 = vsel %vm381_vm4, %v379_v8, -inf  ;;  %v452_v15 = vsel %vm451_vm7, %v409_v44, %v450_v41  ;;  %v798_v4 = vld [vmem:[%s1321_s11] sm:$0xff]  ;;  %v799_v5 = vld [vmem:[%s1321_s11 + $0x8] sm:$0xff] }
 0x17e   :  { %v413_v13 = vrot.slane %v412_v6, 2  ;;  %v425_v19 = vrot.slane %v424_v14, 4  ;;  %v300_v26 = vmax.f32 %v298_v34, %v299_v59  ;;  %v551_v25 = vsel %vm453_vm8, %v293_v9, %v550_v16 }
 0x17f   :  { %v304_v17 = vrot.slane %v303_v11, 2  ;;  %v433_v18 = vmax.f32 %v431_v7, %v432_v12  ;;  %v422_v24 = vrot.slane %v421_v2, 1  ;;  %v313_v32 = vrot.slane %v312_v10, 1  ;;  %v913_v7 = vld [vmem:[%s1318_s8] ss:$0 sm:$0xff] }
 0x180   :  { %v414_v20 = vmax.f32 %v412_v6, %v413_v13  ;;  %v426_v31 = vmax.f32 %v424_v14, %v425_v19  ;;  %v552_v33 = vsel %vm455_vm9, %v300_v26, %v551_v25  ;;  %v999_v30 = vpack.c.bf16 %v715_v57, %v714_v56 }
 0x181   :  { %v305_v27 = vmax.f32 %v303_v11, %v304_v17  ;;  %v434_v29 = vrot.slane %v433_v18, 2  ;;  %v423_v36 = vmax.f32 %v421_v2, %v422_v24  ;;  %v314_v39 = vmax.f32 %v312_v10, %v313_v32  ;;  %v916_v11 = vld [vmem:[%s1322_s12] ss:$0 sm:$0xff] }
 0x182   :  { %v415_v28 = vrot.slane %v414_v20, 1  ;;  %v427_v23 = vrot.slane %v426_v31, 2  ;;  %v1040_v58 = vmov 0.0|0.0   ;;  %v1002_v6 = vpack.c.bf16 %v799_v5, %v798_v4 }
 0x183   :  { %v306_v35 = vrot.slane %v305_v27, 1  ;;  %v435_v22 = vmax.f32 %v433_v18, %v434_v29 }
 0x184   :  { %v416_v21 = vmax.f32 %v414_v20, %v415_v28  ;;  %v428_v34 = vmax.f32 %v426_v31, %v427_v23 }
 0x185   :  { %v307_v37 = vmax.f32 %v305_v27, %v306_v35  ;;  %v436_v38 = vrot.slane %v435_v22, 1 }
 0x186   :  { %v454_v42 = vsel %vm453_vm8, %v416_v21, %v452_v15  ;;  %v429_v44 = vrot.slane %v428_v34, 1 }
 0x187   :  { %v456_v45 = vsel %vm455_vm9, %v423_v36, %v454_v42  ;;  %v553_v46 = vsel %vm457_vm10, %v307_v37, %v552_v33  ;;  %v437_v47 = vmax.f32 %v435_v22, %v436_v38 }
 0x188   :  { %v554_v48 = vsel %vm459_vm11, %v314_v39, %v553_v46  ;;  %v430_v49 = vmax.f32 %v428_v34, %v429_v44 }
 0x18a   :  { %v458_v50 = vsel %vm457_vm10, %v430_v49, %v456_v45 }
 0x18b   :  { %v460_v51 = vsel %vm459_vm11, %v437_v47, %v458_v50 }
 0x18c   :  { %461 = vrot.lane.b32.xlu1 %v460_v51, %s1036_s16  ;;  %s889_s16 = sshll.u32 %s1041_s15, 4  ;;  %s890_s16 = int_to_ptr.vmem [resolvable:$true] %s889_s16 }
 0x18d   :  { %s1011_s11 = scalar_lea.vmem %s890_s16, 128  ;;  %p1016_p1 = scmp.lt.s32.totalorder %s890_s16, %s890_s16 }
 0x18e   :  { %p1012_p0 = scmp.ne.s32.totalorder %s890_s16, %s1011_s11  ;;  %p1017_p2 = scmp.lt.s32.totalorder %s1011_s11, %s1011_s11 }
 0x190   :  { %p1018_p3 = por %p1017_p2, %p1016_p1 }
 0x192   :  { %p1019_p4 = pnand %p1018_p3, %p1012_p0 }
 0x1fe   :  { %v462_v53 = vpop.permute.xlu1 %461 }
 0x1ff   :  { %964 = vmatmul.mubr.msk.f32.vlgmr.msra.gmra.mrb[0].mxu1 %vm463_vm12, %v462_v53 }
 0x200   :  { %967 = vmatpush3.msk.msra.mxu1 %vm466_vm1, %v315_v52  ;;  %968 = vmatprep.mubr.msk.f32.mxu1 %vm1039_vm2, %v1038_v40 }
 0x201   :  { %971 = vmatprep.subr.mxu1 %v1038_v40 }
 0x203   :  { %969 = vmatmul.mubr.msk.f32.vlgmr.msra.gmra.mrb[2].mxu1 %vm463_vm12, %v554_v48 }
 0x204   :  { %972 = vmatpush3.msra.mxu1 %v631_v54  ;;  %973 = vmatprep.mubr.msk.f32.mxu1 %vm1039_vm2, %v1038_v40 }
 0x205   :  { %998 = vmatprep.subr.bf16.mxu1 %v1040_v58 }
 0x207   :  { %974 = vmatmul.mubr.msk.f32.vlgmr.msra.gmra.mrb[4].mxu1 %vm639_vm13, %v630_v55 }
 0x208   :  { %980 = vmatprep.mubr.msk.f32.mxu1 %vm1039_vm2, %v1038_v40  ;;  %1000 = vmatpush3.bf16.msra.mxu1 %v999_v30 }
 0x209   :  { %1001 = vmatprep.subr.bf16.mxu1 %v1040_v58 }
 0x2d2   :  { %v536_v59 = vpop.f32.mrb[0].mxu1 }
 0x2d3   :  { %v965_v60 = vpop.f32.mrb[1].mxu1 }
 0x2d6   :  { %v626_v61 = vpop.f32.mrb[2].mxu1 }
 0x2d7   :  { %v627_v62 = vadd.f32 %v626_v61, %v536_v59  ;;  %v970_v63 = vpop.f32.mrb[3].mxu1 }
 0x2da   :  { %v709_v43 = vpop.f32.mrb[4].mxu1 }
 0x2db   :  { %v710_v1 = vadd.f32 %v911_v0, %v709_v43  ;;  %v975_v2 = vpop.f32.mrb[5].mxu1 }
 0x2dd   :  { %v713_v3 = vmax.f32 %v710_v1, 0.0 }
 0x2df   :  { %981 = vmatmul.mubr.msk.f32.vlgmr.msra.gmra.mrb[6].mxu1 %vm723_vm14, %v713_v3 }
 0x2e0   :  { %987 = vmatprep.mubr.msk.f32.mxu1 %vm1039_vm2, %v1038_v40  ;;  %1003 = vmatpush3.bf16.msra.mxu1 %v1002_v6 }
 0x3b2   :  { %v793_v8 = vpop.f32.mrb[6].mxu1 }
 0x3b3   :  { %v794_v41 = vadd.f32 %v913_v7, %v793_v8  ;;  %v982_v9 = vpop.f32.mrb[7].mxu1 }
 0x3b5   :  { %v797_v10 = vmax.f32 %v794_v41, 0.0 }
 0x3b7   :  { %988 = vmatmul.mubr.msk.f32.vlgmr.msra.gmra.mrb[8].mxu1 %vm723_vm14, %v797_v10 }
 0x48a   :  { %v869_v40 = vpop.f32.mrb[8].mxu1 }
 0x48b   :  { %v873_v12 = vadd.f32 %v869_v40, %v627_v62  ;;  %v989_v13 = vpop.f32.mrb[9].mxu1 }
 0x48d   :  { %v881_v14 = vadd.f32 %v916_v11, %v873_v12 }
 0x48f   :  { %882 = vst [vmem:[#allocation2] sm:$0xff] %v881_v14 }
 0x490   :  { %1022 = shalt.err (!%p1019_p4)
}
 0x491   :  { %s1023_s0 = scalar_lea.hbm %s1323_s13, 128 }
 0x492   :  { %p1024_p5 = scmp.ne.s32.totalorder %s1323_s13, %s1023_s0  ;;  %p1027_p6 = scmp.lt.u32.totalorder %s1023_s0, %s1323_s13 }
 0x494   :  { %p1029_p7 = pnand %p1027_p6, %p1024_p5 }
 0x496   :  { %1032 = shalt.err (!%p1029_p7)
}
 0x497   :  { %892 = dma.vmem_to_hbm [thread:$0]  %s890_s16, 128, %s1323_s13, [#allocation3]  }
 0x498   :  { %1033 = dma.done.wait [#allocation3], 128  }
 0x499   :  { %1034 = vsyncadd [#allocation3], 4294967168 }
 0x49a   :  { %896 = vsyncpa [#allocation3], 1 }

</bundles_post_ra>
